<compile_context>
chip_gen: v6e
topology: v6e:2x2x1
jax: 0.10.0
libtpu: 0.0.40
codegen_flags: <defaults>
</compile_context>

<pallas_src>
import functools

import jax
import jax.numpy as jnp
from jax import lax
from jax.experimental import pallas as pl
from jax.experimental.pallas import tpu as pltpu


# ---------------------------------------------------------------------------
# Helpers
# ---------------------------------------------------------------------------
def _round_up(n, m):
    return ((n + m - 1) // m) * m


def _cdiv(a, b):
    return (a + b - 1) // b


def _physical_vmem_bytes():
    """Physical VMEM per TensorCore; conservative 64 MiB (v7x) fallback."""
    try:
        cap = getattr(pltpu.get_tpu_info(), "vmem_capacity_bytes", None)
        if cap:
            return int(cap)
    except Exception:
        pass
    return 64 * 1024 * 1024


def _plan_k_tiling(m_pad, k_pad, itemsize):
    """Pick K tile (tk), padded K, and an explicit VMEM limit.

    The two double-buffered (m_pad, tk) input slabs are sized against the
    actual chip's VMEM minus the resident f32 Gram/accumulator buffers:
    bigger tk -> fewer ~0.35us grid steps and longer DMAs (closer to the HBM
    roofline) on v5e/v6e, while staying within v7x's 64 MiB.
    """
    cap = _physical_vmem_bytes()
    usable = int(cap * 0.85)                      # headroom: compiler scratch, sems
    resident = 3 * m_pad * m_pad * 4              # f32 Gram/acc + target copy / 2nd out buffer
    slab_budget = max(usable - resident, 2 * m_pad * 128 * itemsize)
    max_tk = max(128, (slab_budget // (2 * m_pad * itemsize)) // 128 * 128)
    n_tiles = _cdiv(k_pad, max_tk)
    tk = _round_up(_cdiv(k_pad, n_tiles), 128)    # <= max_tk, minimizes zero tiles
    k_pad = n_tiles * tk
    need = 2 * m_pad * tk * itemsize + resident
    vmem_limit = int(min(cap, max(need + (4 << 20), 32 << 20)))
    return tk, k_pad, vmem_limit


def _prep_features(x):
    """(a, b, c, d) -> zero-padded (m_pad, k_pad) feature matrix (native dtype)
    plus (m, m_pad, k_pad, tk, vmem_limit)."""
    a, b, c, d = x.shape
    m, k = a * b, c * d
    feats = x.reshape(m, k)                       # keep native dtype (bf16 stays bf16)
    # Lane-dense Gram: pad M to a multiple of 128 (unmasked vst, full MXU N
    # columns; also satisfies bf16(16)/int8(32) sublane packing).  Zero rows
    # keep the math exact.
    m_pad = _round_up(m, 128)
    k_pad = _round_up(k, 128)
    tk, k_pad, vmem_limit = _plan_k_tiling(m_pad, k_pad, feats.dtype.itemsize)
    if (m_pad, k_pad) != (m, k):
        feats = jnp.pad(feats, ((0, m_pad - m), (0, k_pad - k)))
    return feats, m, m_pad, k_pad, tk, vmem_limit


# ---------------------------------------------------------------------------
# Kernels
# ---------------------------------------------------------------------------
def _gram_kernel(feat_ref, g_ref, *, inv_norm):
    """Accumulate F @ F^T directly into the resident f32 output block."""
    kk = pl.program_id(0)

    @pl.when(kk == 0)
    def _():
        g_ref[...] = jnp.zeros_like(g_ref)

    f = feat_ref[...]
    # Contract both operands on the last (K) axis: F @ F^T without a transpose.
    g_ref[...] += lax.dot_general(
        f, f,
        dimension_numbers=(((1,), (1,)), ((), ())),
        preferred_element_type=jnp.float32,
    )

    @pl.when(kk == pl.num_programs(0) - 1)
    def _():
        g_ref[...] *= inv_norm


def _style_loss_kernel(feat_ref, tgt_hbm_ref, loss_ref, acc_ref, *,
                       inv_norm, inv_count, m_pad):
    """Fused, loss-only: accumulate Gram over K tiles; at the last step DMA the
    target Gram from HBM into a scoped VMEM buffer and reduce to the MSE."""
    kk = pl.program_id(0)

    @pl.when(kk == 0)
    def _():
        acc_ref[...] = jnp.zeros_like(acc_ref)

    f = feat_ref[...]
    acc_ref[...] += lax.dot_general(
        f, f,
        dimension_numbers=(((1,), (1,)), ((), ())),
        preferred_element_type=jnp.float32,
    )

    @pl.when(kk == pl.num_programs(0) - 1)
    def _():
        def finalize(tgt_vmem, sem):
            cp = pltpu.make_async_copy(tgt_hbm_ref, tgt_vmem, sem)
            cp.start()
            cp.wait()
            diff = acc_ref[...] * inv_norm - tgt_vmem[...]
            # Padded rows/cols are zero in both operands -> diff == 0 there, so
            # a full-block sum divided by the true M*M is the exact MSE.
            loss_ref[0, 0] = jnp.sum(diff * diff) * inv_count

        pl.run_scoped(finalize,
                      pltpu.VMEM((m_pad, m_pad), jnp.float32),
                      pltpu.SemaphoreType.DMA(()))


# ---------------------------------------------------------------------------
# Wrappers
# ---------------------------------------------------------------------------
def _gram_padded(feats, m_pad, k_pad, tk, inv_norm, vmem_limit):
    return pl.pallas_call(
        functools.partial(_gram_kernel, inv_norm=inv_norm),
        out_shape=jax.ShapeDtypeStruct((m_pad, m_pad), jnp.float32),
        grid_spec=pltpu.PrefetchScalarGridSpec(
            num_scalar_prefetch=0,
            grid=(k_pad // tk,),
            in_specs=[pl.BlockSpec((m_pad, tk), lambda kk: (0, kk))],
            out_specs=pl.BlockSpec((m_pad, m_pad), lambda kk: (0, 0)),
        ),
        compiler_params=pltpu.CompilerParams(
            dimension_semantics=("arbitrary",),
            vmem_limit_bytes=vmem_limit),
    )(feats)


def gram_matrix(x, *, _return_padded=False):
    """Pallas equivalent of the PyTorch gram_matrix helper.  x: (a, b, c, d)."""
    a, b, c, d = x.shape
    feats, m, m_pad, k_pad, tk, vmem_limit = _prep_features(x)
    inv_norm = 1.0 / float(a * b * c * d)
    g = _gram_padded(feats, m_pad, k_pad, tk, inv_norm, vmem_limit)
    if _return_padded:
        return g, m          # padded Gram kept for internal StyleLoss use
    return g[:m, :m]


def style_loss_forward(x, target_gram):
    """Returns (input, loss) — mirrors StyleLoss.forward semantics.

    Accepts the target Gram either unpadded (m, m) or already zero-padded to
    (m_pad, m_pad).  The input's Gram matrix never leaves VMEM."""
    a, b, c, d = x.shape
    feats, m, m_pad, k_pad, tk, vmem_limit = _prep_features(x)
    inv_norm = 1.0 / float(a * b * c * d)
    inv_count = 1.0 / float(m * m)

    tgt = target_gram.astype(jnp.float32)
    if tgt.shape != (m_pad, m_pad):
        tgt = jnp.pad(tgt, ((0, m_pad - tgt.shape[0]), (0, m_pad - tgt.shape[1])))

    loss = pl.pallas_call(
        functools.partial(_style_loss_kernel, inv_norm=inv_norm,
                          inv_count=inv_count, m_pad=m_pad),
        out_shape=jax.ShapeDtypeStruct((1, 1), jnp.float32),
        grid_spec=pltpu.PrefetchScalarGridSpec(
            num_scalar_prefetch=0,
            grid=(k_pad // tk,),
            in_specs=[
                pl.BlockSpec((m_pad, tk), lambda kk: (0, kk)),
                pl.BlockSpec(memory_space=pl.ANY),   # target stays in HBM until the last step
            ],
            out_specs=pl.BlockSpec(memory_space=pltpu.SMEM),
            scratch_shapes=[pltpu.VMEM((m_pad, m_pad), jnp.float32)],
        ),
        compiler_params=pltpu.CompilerParams(
            dimension_semantics=("arbitrary",),
            vmem_limit_bytes=vmem_limit),
    )(feats, tgt)
    # forward() returns the input unchanged; loss is stored as a side value.
    return x, loss[0, 0]


class StyleLoss:
    """JAX/Pallas mirror of the PyTorch StyleLoss module."""

    def __init__(self, target_feature):
        # Keep the padded target Gram resident ("detached"); the loss kernel
        # consumes it directly, skipping a slice + re-pad per call.
        self._target_padded, self._m = gram_matrix(target_feature,
                                                    _return_padded=True)
        self.loss = None

    @property
    def target(self):
        return self._target_padded[:self._m, :self._m]

    def __call__(self, x):
        out, self.loss = style_loss_forward(x, self._target_padded)
        return out


# ---------------------------------------------------------------------------
# Demo / smoke test
# ---------------------------------------------------------------------------
if __name__ == "__main__":
    key = jax.random.PRNGKey(0)
    k_tgt, k_in = jax.random.split(key)

    a, b, c, d = 2, 4, 16, 16  # NCHW
    target_feature = jax.random.normal(k_tgt, (a, b, c, d), dtype=jnp.float32)
    x = jax.random.normal(k_in, (a, b, c, d), dtype=jnp.float32)

    module = StyleLoss(target_feature)
    out = module(x)
    out = jax.block_until_ready(out)
    loss = jax.block_until_ready(module.loss)

    # Reference check (plain JAX) to make sure semantics match PyTorch.
    def ref_gram(t):
        f = t.reshape(a * b, c * d)
        return (f @ f.T) / (a * b * c * d)

    g_ref_in = ref_gram(x)
    g_ref_tgt = ref_gram(target_feature)
    loss_ref = jnp.mean((g_ref_in - g_ref_tgt) ** 2)

    g_pallas_tgt = module.target
    g_pallas_in = gram_matrix(x)          # standalone helper path
    assert out.shape == x.shape
    assert jnp.allclose(out, x)
    assert jnp.allclose(g_pallas_tgt, g_ref_tgt, rtol=1e-5, atol=1e-6)
    assert jnp.allclose(g_pallas_in, g_ref_in, rtol=1e-5, atol=1e-6)
    assert jnp.allclose(loss, loss_ref, rtol=1e-5, atol=1e-6)

    print("KERNEL_OK")
</pallas_src>

<mosaic_0001>
module attributes {stable_mosaic.version = 11 : i64} {
  func.func @_gram_kernel(%arg0: i32, %arg1: memref<128x256xf32, #tpu.memory_space<vmem>>, %arg2: memref<128x128xf32, #tpu.memory_space<vmem>>) attributes {dimension_semantics = [#tpu.dimension_semantics<arbitrary>], iteration_bounds = array<i64: 1>, scalar_prefetch = 0 : i64, scratch_operands = 0 : i64, tpu.core_type = #tpu.core_type<tc>, window_params = [{transform_indices = @transform_0, window_bounds = array<i64: 128, 256>}, {pipeline_mode = #tpu.pipeline_mode<synchronous>, transform_indices = @transform_1, window_bounds = array<i64: 128, 128>}]} {
    %c0_i32 = arith.constant 0 : i32
    %0 = arith.cmpi eq, %arg0, %c0_i32 : i32
    %1 = arith.extui %0 : i1 to i32
    %c0_i32_0 = arith.constant 0 : i32
    %2 = arith.cmpi ne, %1, %c0_i32_0 : i32
    scf.if %2 {
      %cst_8 = arith.constant 0.000000e+00 : f32
      %11 = vector.broadcast %cst_8 : f32 to vector<128x128xf32>
      %c0_9 = arith.constant 0 : index
      %c0_10 = arith.constant 0 : index
      %12 = vector.load %arg2[%c0_9, %c0_10] : memref<128x128xf32, #tpu.memory_space<vmem>>, vector<128x128xf32>
      tpu.vector_store %arg2[%c0_9, %c0_10], %11 {strides = array<i32>} : memref<128x128xf32, #tpu.memory_space<vmem>>, vector<128x128xf32>,
    } else {
    }
    %c0 = arith.constant 0 : index
    %c0_1 = arith.constant 0 : index
    %3 = vector.load %arg1[%c0, %c0_1] : memref<128x256xf32, #tpu.memory_space<vmem>>, vector<128x256xf32>
    %c0_2 = arith.constant 0 : index
    %c0_3 = arith.constant 0 : index
    %4 = vector.load %arg2[%c0_2, %c0_3] : memref<128x128xf32, #tpu.memory_space<vmem>>, vector<128x128xf32>
    %cst = arith.constant dense<0.000000e+00> : vector<128x128xf32>
    %5 = tpu.matmul %3, %3, %cst {dimension_numbers = #tpu.dot_dimension_numbers<[1], [1], [0], [0], [0, 0, 1, 0], [], []>} : vector<128x256xf32>, vector<128x256xf32>, vector<128x128xf32> -> vector<128x128xf32>
    %6 = arith.addf %4, %5 : vector<128x128xf32>
    %c0_4 = arith.constant 0 : index
    %c0_5 = arith.constant 0 : index
    %7 = vector.load %arg2[%c0_4, %c0_5] : memref<128x128xf32, #tpu.memory_space<vmem>>, vector<128x128xf32>
    tpu.vector_store %arg2[%c0_4, %c0_5], %6 {strides = array<i32>} : memref<128x128xf32, #tpu.memory_space<vmem>>, vector<128x128xf32>,
    %c0_i32_6 = arith.constant 0 : i32
    %8 = arith.cmpi eq, %arg0, %c0_i32_6 : i32
    %9 = arith.extui %8 : i1 to i32
    %c0_i32_7 = arith.constant 0 : i32
    %10 = arith.cmpi ne, %9, %c0_i32_7 : i32
    scf.if %10 {
      %c0_8 = arith.constant 0 : index
      %c0_9 = arith.constant 0 : index
      %11 = vector.load %arg2[%c0_8, %c0_9] : memref<128x128xf32, #tpu.memory_space<vmem>>, vector<128x128xf32>
      %cst_10 = arith.constant 4.8828125E-4 : f32
      %12 = vector.broadcast %cst_10 : f32 to vector<128x128xf32>
      %13 = arith.mulf %11, %12 : vector<128x128xf32>
      %c0_11 = arith.constant 0 : index
      %c0_12 = arith.constant 0 : index
      %14 = vector.load %arg2[%c0_11, %c0_12] : memref<128x128xf32, #tpu.memory_space<vmem>>, vector<128x128xf32>
      tpu.vector_store %arg2[%c0_11, %c0_12], %13 {strides = array<i32>} : memref<128x128xf32, #tpu.memory_space<vmem>>, vector<128x128xf32>,
    } else {
    }
    return
  }
  func.func @transform_0(%arg0: i32) -> (i32, i32) {
    %c0_i32 = arith.constant 0 : i32
    %c0_i32_0 = arith.constant 0 : i32
    return %c0_i32, %arg0 : i32, i32
  }
  func.func @transform_1(%arg0: i32) -> (i32, i32) {
    %c0_i32 = arith.constant 0 : i32
    %c0_i32_0 = arith.constant 0 : i32
    %c0_i32_1 = arith.constant 0 : i32
    return %c0_i32, %c0_i32_0 : i32, i32
  }
}

</mosaic_0001>

<bundles_post_ra>
// kernel: tpu_custom_call.1
= control target key start
LH: loop header
LB: loop body
LE: loop exit
PB: predicated region body
PF: predicated region fallthrough
CT: control target
= control target key end

     0   :  { %6 = vsyncpa [#allocation3], 0  ;;  %s521_s0 = inlined_call_operand.hbm [shape: f32[128,256], index: 0, kind: input, shape index: {}]   ;;  %s522_s1 = inlined_call_operand.hbm [shape: f32[128,128], index: 1, kind: output, shape index: {}]  }
   0x1   :  { %7 = vsyncpa [#allocation4], 0  ;;  %s419_s6 = smov [#allocation2]  }
   0x2   :  { %s13_s7 = sshll.u32 %s419_s6, 4  ;;  %s14_s7 = int_to_ptr.vmem [resolvable:$true] %s13_s7 }
   0x3   :  { %s383_s8 = scalar_lea.vmem %s14_s7, 4096  ;;  %p388_p1 = scmp.lt.s32.totalorder %s14_s7, %s14_s7 }
   0x4   :  { %p384_p0 = scmp.ne.s32.totalorder %s14_s7, %s383_s8  ;;  %p389_p2 = scmp.lt.s32.totalorder %s383_s8, %s383_s8 }
   0x6   :  { %p390_p3 = por %p389_p2, %p388_p1 }
   0x8   :  { %p391_p4 = pnand %p390_p3, %p384_p0 }
   0xa   :  { %394 = shalt.err (!%p391_p4)
}
   0xb   :  { %s420_s9 = smov 256   ;;  %s421_s10 = smov 16  }
   0xc   :  { %19 = dma.hbm_to_vmem [thread:$0]  %s521_s0, 4096, %s14_s7, [#allocation3], %s420_s9, %s420_s9, %s421_s10  }
   0xd   :  { %415 = dma.done.wait [#allocation3], 4096  }
   0xe   :  { %416 = vsyncadd [#allocation3], 4294963200  ;;  %v438_v0 = vld [vmem:[#allocation2 + $0xf8] sm:$0xff]  ;;  %v440_v1 = vld [vmem:[#allocation2 + $0xf0] sm:$0xff]  ;;  %s422_s0 = smov [#allocation5]  }
   0xf   :  { %v442_v2 = vld [vmem:[#allocation2 + $0xe8] sm:$0xff]  ;;  %91 = vmatprep.subr.mxu0 %v438_v0  ;;  %336 = vmatprep.subr.mxu1 %v438_v0  ;;  %v450_v3 = vld [vmem:[#allocation2 + $0xe0] sm:$0xff]  ;;  %v452_v4 = vld [vmem:[#allocation2 + $0xd8] sm:$0xff]  ;;  %s324_s13 = sshll.u32 %s422_s0, 4  ;;  %s325_s13 = int_to_ptr.vmem [resolvable:$true] %s324_s13 }
  0x10   :  { %92 = vmatpush1.xpose.msra.mxu0 %v440_v1  ;;  %352 = vmatpush1.xpose.msra.mxu1 %v440_v1  ;;  %v60_v5 = vld [vmem:[#allocation2 + $0x88] sm:$0xff]  ;;  %v458_v6 = vld [vmem:[#allocation2 + $0xd0] sm:$0xff]  ;;  %v466_v8 = vld [vmem:[#allocation2 + $0xc0] sm:$0xff]  ;;  %s395_s14 = scalar_lea.vmem %s325_s13, 2048  ;;  %p400_p6 = scmp.lt.s32.totalorder %s325_s13, %s325_s13 }
  0x11   :  { %93 = vmatprep.subr.mxu0 %v442_v2  ;;  %337 = vmatprep.subr.mxu1 %v442_v2  ;;  %v460_v7 = vld [vmem:[#allocation2 + $0xc8] sm:$0xff]  ;;  %v470_v10 = vld [vmem:[#allocation2 + $0xb8] sm:$0xff]  ;;  %v477_v11 = vld [vmem:[#allocation2 + $0xb0] sm:$0xff]  ;;  %p396_p5 = scmp.ne.s32.totalorder %s325_s13, %s395_s14  ;;  %p401_p7 = scmp.lt.s32.totalorder %s395_s14, %s395_s14 }
  0x12   :  { %195 = vmatprep.mubr.f32.mxu1 %v60_v5  ;;  %v468_v9 = vld [vmem:[#allocation2 + $0x8] sm:$0xff]  ;;  %v485_v13 = vld [vmem:[#allocation2 + $0xa0] sm:$0xff]  ;;  %v62_v14 = vld [vmem:[#allocation2 + $0x98] sm:$0xff] }
  0x13   :  { %155 = vmatprep.mubr.f32.mxu0 %v468_v9  ;;  %v479_v12 = vld [vmem:[#allocation2 + $0xa8] sm:$0xff]  ;;  %v61_v15 = vld [vmem:[#allocation2 + $0x90] sm:$0xff]  ;;  %v59_v16 = vld [vmem:[#allocation2 + $0x80] sm:$0xff]  ;;  %p402_p8 = por %p401_p7, %p400_p6 }
  0x14   :  { %94 = vmatpush1.xpose.msra.mxu0 %v450_v3  ;;  %353 = vmatpush1.xpose.msra.mxu1 %v450_v3  ;;  %v489_v17 = vld [vmem:[#allocation2 + $0x78] sm:$0xff]  ;;  %v493_v18 = vld [vmem:[#allocation2 + $0x70] sm:$0xff]  ;;  %v495_v19 = vld [vmem:[#allocation2 + $0x68] sm:$0xff] }
  0x15   :  { %95 = vmatprep.subr.mxu0 %v452_v4  ;;  %338 = vmatprep.subr.mxu1 %v452_v4  ;;  %v55_v20 = vld [vmem:[#allocation2 + $0x60] sm:$0xff]  ;;  %v54_v21 = vld [vmem:[#allocation2 + $0x58] sm:$0xff]  ;;  %v53_v22 = vld [vmem:[#allocation2 + $0x50] sm:$0xff]  ;;  %p403_p9 = pnand %p402_p8, %p396_p5 }
  0x16   :  { %v52_v23 = vld [vmem:[#allocation2 + $0x48] sm:$0xff]  ;;  %v51_v24 = vld [vmem:[#allocation2 + $0x40] sm:$0xff]  ;;  %v50_v25 = vld [vmem:[#allocation2 + $0x38] sm:$0xff] }
  0x17   :  { %v49_v26 = vld [vmem:[#allocation2 + $0x30] sm:$0xff]  ;;  %v48_v27 = vld [vmem:[#allocation2 + $0x28] sm:$0xff]  ;;  %v47_v28 = vld [vmem:[#allocation2 + $0x20] sm:$0xff] }
  0x18   :  { %96 = vmatpush1.xpose.msra.mxu0 %v458_v6  ;;  %354 = vmatpush1.xpose.msra.mxu1 %v458_v6  ;;  %v46_v29 = vld [vmem:[#allocation2 + $0x18] sm:$0xff]  ;;  %v45_v30 = vld [vmem:[#allocation2 + $0x10] sm:$0xff]  ;;  %v43_v31 = vld [vmem:[#allocation2] sm:$0xff] }
  0x19   :  { %97 = vmatprep.subr.mxu0 %v460_v7  ;;  %339 = vmatprep.subr.mxu1 %v460_v7 }
  0x1c   :  { %98 = vmatpush1.xpose.msra.mxu0 %v466_v8  ;;  %355 = vmatpush1.xpose.msra.mxu1 %v466_v8 }
  0x1d   :  { %99 = vmatprep.subr.mxu0 %v470_v10  ;;  %340 = vmatprep.subr.mxu1 %v470_v10 }
  0x20   :  { %100 = vmatpush1.xpose.msra.mxu0 %v477_v11  ;;  %356 = vmatpush1.xpose.msra.mxu1 %v477_v11 }
  0x21   :  { %101 = vmatprep.subr.mxu0 %v479_v12  ;;  %341 = vmatprep.subr.mxu1 %v479_v12 }
  0x24   :  { %102 = vmatpush1.xpose.msra.mxu0 %v485_v13  ;;  %357 = vmatpush1.xpose.msra.mxu1 %v485_v13 }
  0x25   :  { %103 = vmatprep.subr.mxu0 %v62_v14  ;;  %342 = vmatprep.subr.mxu1 %v62_v14 }
  0x28   :  { %104 = vmatpush1.xpose.msra.mxu0 %v61_v15  ;;  %358 = vmatpush1.xpose.msra.mxu1 %v61_v15 }
  0x29   :  { %105 = vmatprep.subr.mxu0 %v60_v5  ;;  %343 = vmatprep.subr.mxu1 %v60_v5 }
  0x2c   :  { %106 = vmatpush1.xpose.msra.mxu0 %v59_v16  ;;  %359 = vmatpush1.xpose.msra.mxu1 %v59_v16 }
  0x2d   :  { %107 = vmatprep.subr.mxu0 %v489_v17  ;;  %344 = vmatprep.subr.mxu1 %v489_v17 }
  0x30   :  { %108 = vmatpush1.xpose.msra.mxu0 %v493_v18  ;;  %360 = vmatpush1.xpose.msra.mxu1 %v493_v18 }
  0x31   :  { %109 = vmatprep.subr.mxu0 %v495_v19  ;;  %345 = vmatprep.subr.mxu1 %v495_v19 }
  0x34   :  { %110 = vmatpush1.xpose.msra.mxu0 %v55_v20  ;;  %361 = vmatpush1.xpose.msra.mxu1 %v55_v20 }
  0x35   :  { %111 = vmatprep.subr.mxu0 %v54_v21  ;;  %346 = vmatprep.subr.mxu1 %v54_v21 }
  0x38   :  { %112 = vmatpush1.xpose.msra.mxu0 %v53_v22  ;;  %362 = vmatpush1.xpose.msra.mxu1 %v53_v22 }
  0x39   :  { %113 = vmatprep.subr.mxu0 %v52_v23  ;;  %347 = vmatprep.subr.mxu1 %v52_v23 }
  0x3c   :  { %114 = vmatpush1.xpose.msra.mxu0 %v51_v24  ;;  %363 = vmatpush1.xpose.msra.mxu1 %v51_v24 }
  0x3d   :  { %115 = vmatprep.subr.mxu0 %v50_v25  ;;  %348 = vmatprep.subr.mxu1 %v50_v25 }
  0x40   :  { %116 = vmatpush1.xpose.msra.mxu0 %v49_v26  ;;  %364 = vmatpush1.xpose.msra.mxu1 %v49_v26 }
  0x41   :  { %117 = vmatprep.subr.mxu0 %v48_v27  ;;  %349 = vmatprep.subr.mxu1 %v48_v27 }
  0x44   :  { %118 = vmatpush1.xpose.msra.mxu0 %v47_v28  ;;  %365 = vmatpush1.xpose.msra.mxu1 %v47_v28 }
  0x45   :  { %119 = vmatprep.subr.mxu0 %v46_v29  ;;  %350 = vmatprep.subr.mxu1 %v46_v29 }
  0x48   :  { %120 = vmatpush1.xpose.msra.mxu0 %v45_v30  ;;  %366 = vmatpush1.xpose.msra.mxu1 %v45_v30 }
  0x49   :  { %121 = vmatprep.subr.mxu0 %v468_v9  ;;  %351 = vmatprep.subr.mxu1 %v468_v9 }
  0x4c   :  { %122 = vmatpush1.xpose.msra.mxu0 %v43_v31  ;;  %367 = vmatpush1.xpose.msra.mxu1 %v43_v31 }
  0x4f   :  { %156 = vmatmul.mubr.f32.vlgmr.msra.gmra.mxu0 %v43_v31  ;;  %196 = vmatmul.mubr.f32.vlgmr.msra.gmra.mxu1 %v59_v16 }
  0x50   :  { %160 = vmatprep.mubr.f32.mxu0 %v46_v29  ;;  %200 = vmatprep.mubr.f32.mxu1 %v62_v14 }
  0x53   :  { %161 = vmatmul.mubr.f32.gmra.mxu0 %v45_v30  ;;  %201 = vmatmul.mubr.f32.gmra.mxu1 %v61_v15 }
  0x54   :  { %165 = vmatprep.mubr.f32.mxu0 %v48_v27  ;;  %205 = vmatprep.mubr.f32.mxu1 %v479_v12 }
  0x57   :  { %166 = vmatmul.mubr.f32.gmra.mxu0 %v47_v28  ;;  %206 = vmatmul.mubr.f32.gmra.mxu1 %v485_v13 }
  0x58   :  { %170 = vmatprep.mubr.f32.mxu0 %v50_v25  ;;  %210 = vmatprep.mubr.f32.mxu1 %v470_v10 }
  0x5b   :  { %171 = vmatmul.mubr.f32.gmra.mxu0 %v49_v26  ;;  %211 = vmatmul.mubr.f32.gmra.mxu1 %v477_v11 }
  0x5c   :  { %175 = vmatprep.mubr.f32.mxu0 %v52_v23  ;;  %215 = vmatprep.mubr.f32.mxu1 %v460_v7 }
  0x5f   :  { %176 = vmatmul.mubr.f32.gmra.mxu0 %v51_v24  ;;  %216 = vmatmul.mubr.f32.gmra.mxu1 %v466_v8 }
  0x60   :  { %180 = vmatprep.mubr.f32.mxu0 %v54_v21  ;;  %220 = vmatprep.mubr.f32.mxu1 %v452_v4 }
  0x63   :  { %181 = vmatmul.mubr.f32.gmra.mxu0 %v53_v22  ;;  %221 = vmatmul.mubr.f32.gmra.mxu1 %v458_v6 }
  0x64   :  { %185 = vmatprep.mubr.f32.mxu0 %v495_v19  ;;  %225 = vmatprep.mubr.f32.mxu1 %v442_v2 }
  0x67   :  { %186 = vmatmul.mubr.f32.gmra.mxu0 %v55_v20  ;;  %226 = vmatmul.mubr.f32.gmra.mxu1 %v450_v3 }
  0x68   :  { %190 = vmatprep.mubr.f32.mxu0 %v489_v17  ;;  %230 = vmatprep.mubr.f32.mxu1 %v438_v0 }
  0x6b   :  { %191 = vmatmul.mubr.f32.gmra.mxu0 %v493_v18  ;;  %231 = vmatmul.mubr.f32.gmra.mxu1 %v440_v1 }
 0x10f   :  { %v157_v32 = vpop.f32.mrf.mxu0  ;;  %v197_v33 = vpop.f32.mrf.mxu1 }
 0x110   :  { %v287_v36 = vmul.f32 0.00048828125, %v157_v32  ;;  %v295_v37 = vmul.f32 0.00048828125, %v197_v33 }
 0x111   :  { %v159_v34 = vpop.f32.mrf.mxu0  ;;  %v199_v35 = vpop.f32.mrf.mxu1 }
 0x112   :  { %303 = vst [vmem:[#allocation5] sm:$0xff] %v287_v36  ;;  %311 = vst [vmem:[#allocation5 + $0x40] sm:$0xff] %v295_v37 }
 0x113   :  { %v162_v38 = vpop.f32.mrf.mxu0  ;;  %v202_v39 = vpop.f32.mrf.mxu1 }
 0x114   :  { %v288_v42 = vmul.f32 0.00048828125, %v162_v38  ;;  %v296_v43 = vmul.f32 0.00048828125, %v202_v39 }
 0x115   :  { %v164_v40 = vpop.f32.mrf.mxu0  ;;  %v204_v41 = vpop.f32.mrf.mxu1 }
 0x116   :  { %304 = vst [vmem:[#allocation5 + $0x8] sm:$0xff] %v288_v42  ;;  %312 = vst [vmem:[#allocation5 + $0x48] sm:$0xff] %v296_v43 }
 0x117   :  { %v167_v44 = vpop.f32.mrf.mxu0  ;;  %v207_v45 = vpop.f32.mrf.mxu1 }
 0x118   :  { %v289_v48 = vmul.f32 0.00048828125, %v167_v44  ;;  %v297_v49 = vmul.f32 0.00048828125, %v207_v45 }
 0x119   :  { %v169_v46 = vpop.f32.mrf.mxu0  ;;  %v209_v47 = vpop.f32.mrf.mxu1 }
 0x11a   :  { %305 = vst [vmem:[#allocation5 + $0x10] sm:$0xff] %v289_v48  ;;  %313 = vst [vmem:[#allocation5 + $0x50] sm:$0xff] %v297_v49 }
 0x11b   :  { %v172_v50 = vpop.f32.mrf.mxu0  ;;  %v212_v51 = vpop.f32.mrf.mxu1 }
 0x11c   :  { %v290_v54 = vmul.f32 0.00048828125, %v172_v50  ;;  %v298_v55 = vmul.f32 0.00048828125, %v212_v51 }
 0x11d   :  { %v174_v52 = vpop.f32.mrf.mxu0  ;;  %v214_v53 = vpop.f32.mrf.mxu1 }
 0x11e   :  { %306 = vst [vmem:[#allocation5 + $0x18] sm:$0xff] %v290_v54  ;;  %314 = vst [vmem:[#allocation5 + $0x58] sm:$0xff] %v298_v55 }
 0x11f   :  { %v177_v56 = vpop.f32.mrf.mxu0  ;;  %v217_v57 = vpop.f32.mrf.mxu1 }
 0x120   :  { %v291_v60 = vmul.f32 0.00048828125, %v177_v56  ;;  %v299_v61 = vmul.f32 0.00048828125, %v217_v57 }
 0x121   :  { %v179_v58 = vpop.f32.mrf.mxu0  ;;  %v219_v59 = vpop.f32.mrf.mxu1 }
 0x122   :  { %307 = vst [vmem:[#allocation5 + $0x20] sm:$0xff] %v291_v60  ;;  %315 = vst [vmem:[#allocation5 + $0x60] sm:$0xff] %v299_v61 }
 0x123   :  { %v182_v62 = vpop.f32.mrf.mxu0  ;;  %v222_v63 = vpop.f32.mrf.mxu1 }
 0x124   :  { %v292_v2 = vmul.f32 0.00048828125, %v182_v62  ;;  %v300_v3 = vmul.f32 0.00048828125, %v222_v63 }
 0x125   :  { %v184_v0 = vpop.f32.mrf.mxu0  ;;  %v224_v1 = vpop.f32.mrf.mxu1 }
 0x126   :  { %308 = vst [vmem:[#allocation5 + $0x28] sm:$0xff] %v292_v2  ;;  %316 = vst [vmem:[#allocation5 + $0x68] sm:$0xff] %v300_v3 }
 0x127   :  { %v187_v4 = vpop.f32.mrf.mxu0  ;;  %v227_v5 = vpop.f32.mrf.mxu1 }
 0x128   :  { %v293_v8 = vmul.f32 0.00048828125, %v187_v4  ;;  %v301_v9 = vmul.f32 0.00048828125, %v227_v5 }
 0x129   :  { %v189_v6 = vpop.f32.mrf.mxu0  ;;  %v229_v7 = vpop.f32.mrf.mxu1 }
 0x12a   :  { %309 = vst [vmem:[#allocation5 + $0x30] sm:$0xff] %v293_v8  ;;  %317 = vst [vmem:[#allocation5 + $0x70] sm:$0xff] %v301_v9 }
 0x12b   :  { %v192_v10 = vpop.f32.mrf.mxu0  ;;  %v232_v11 = vpop.f32.mrf.mxu1 }
 0x12c   :  { %v294_v14 = vmul.f32 0.00048828125, %v192_v10  ;;  %v302_v15 = vmul.f32 0.00048828125, %v232_v11 }
 0x12d   :  { %v194_v12 = vpop.f32.mrf.mxu0  ;;  %v234_v13 = vpop.f32.mrf.mxu1 }
 0x12e   :  { %310 = vst [vmem:[#allocation5 + $0x38] sm:$0xff] %v294_v14  ;;  %318 = vst [vmem:[#allocation5 + $0x78] sm:$0xff] %v302_v15 }
 0x12f   :  { %406 = shalt.err (!%p403_p9)
}
 0x130   :  { %s423_s15 = smov 128   ;;  %s424_s16 = smov 8  }
 0x131   :  { %330 = dma.vmem_to_hbm [thread:$0]  %s325_s13, 2048, %s522_s1, [#allocation4], %s423_s15, %s423_s15, %s424_s16  }
 0x132   :  { %417 = dma.done.wait [#allocation4], 2048  }
 0x133   :  { %418 = vsyncadd [#allocation4], 4294965248 }
 0x134   :  { %334 = vsyncpa [#allocation3], 1 }
 0x135   :  { %335 = vsyncpa [#allocation4], 1 }

</bundles_post_ra>
